<compile_context>
chip_gen: v7x
topology: tpu7x:2x2x1
jax: 0.10.0
libtpu: 0.0.40
codegen_flags: <defaults>
</compile_context>

<pallas_src>
import functools

import jax
import jax.numpy as jnp
from jax.experimental import pallas as pl
from jax.experimental.pallas import tpu as pltpu

LANE = 128          # vreg lane width
SUBLANE_BF16 = 16   # bf16 packs 16 sublanes per vreg


def _round_up(n, m):
    return ((n + m - 1) // m) * m


def qnetwork_kernel(x_ref, w1_ref, b1_ref, w2_ref, b2_ref, w3_ref, b3_ref, o_ref):
    # fc1: bf16 operands on the MXU, f32 accumulation; bias add + ReLU in f32 (VPU).
    h1 = jnp.dot(x_ref[...], w1_ref[...], preferred_element_type=jnp.float32)
    h1 = jnp.maximum(h1 + b1_ref[...], 0.0)
    # fc2
    h2 = jnp.dot(h1.astype(jnp.bfloat16), w2_ref[...],
                 preferred_element_type=jnp.float32)
    h2 = jnp.maximum(h2 + b2_ref[...], 0.0)
    # fc3 (no activation): output width == true action_size (no lane padding,
    # so the HBM writeback is only the useful bytes).
    q = jnp.dot(h2.astype(jnp.bfloat16), w3_ref[...],
                preferred_element_type=jnp.float32)
    o_ref[...] = (q + b3_ref[...]).astype(o_ref.dtype)


def prepare_params(params):
    """Pad hidden dims to the lane width and cast matmul operands to bf16 ONCE.

    Weight layout: [in_features, out_features] (transposed vs. torch.nn.Linear).
    fc3's output dim (action_size) is intentionally left unpadded.
    """
    w1, b1 = params["w1"], params["b1"]
    w2, b2 = params["w2"], params["b2"]
    w3, b3 = params["w3"], params["b3"]

    S, H1 = w1.shape
    H2, A = w3.shape
    H1p, H2p = _round_up(H1, LANE), _round_up(H2, LANE)

    def pad2(a, rows, cols, dtype):
        return jnp.pad(a, ((0, rows - a.shape[0]),
                           (0, cols - a.shape[1]))).astype(dtype)

    return {
        "w1": pad2(w1, S,   H1p, jnp.bfloat16),
        "b1": pad2(b1, 1,   H1p, jnp.float32),
        "w2": pad2(w2, H1p, H2p, jnp.bfloat16),
        "b2": pad2(b2, 1,   H2p, jnp.float32),
        "w3": pad2(w3, H2p, A,   jnp.bfloat16),   # rows padded, action cols not
        "b3": b3.astype(jnp.float32),
    }


def qnetwork_forward(x, prepared, *, tile_b=2048):
    """x: [B, state_size] float32.  prepared: output of prepare_params().

    Returns Q-values [B, action_size] float32 (matches the PyTorch forward;
    bf16 matmul operands, f32 accumulation / epilogue).
    """
    w1, b1 = prepared["w1"], prepared["b1"]
    w2, b2 = prepared["w2"], prepared["b2"]
    w3, b3 = prepared["w3"], prepared["b3"]

    B, S = x.shape
    H1p, H2p, A = w1.shape[1], w2.shape[1], w3.shape[1]

    # --- batch tile: multiple of 16 (bf16 sublanes); big enough to amortize the
    # ~0.35 us per-grid-step overhead, but capped so the grid has >= 2 steps when
    # there is enough batch to split across both TensorCores on v7x. ---
    tb = _round_up(min(tile_b, B), SUBLANE_BF16)
    Bp = _round_up(B, tb)
    if Bp // tb < 2 and B > 2 * SUBLANE_BF16:
        tb = _round_up((B + 1) // 2, SUBLANE_BF16)
        Bp = _round_up(B, tb)

    xp = jnp.pad(x, ((0, Bp - B), (0, 0))).astype(jnp.bfloat16)

    # Constant index_map -> fetched once, VMEM-resident across grid steps.
    resident = lambda shape: pl.BlockSpec(shape, lambda i: (0, 0))

    out = pl.pallas_call(
        qnetwork_kernel,
        out_shape=jax.ShapeDtypeStruct((Bp, A), jnp.float32),
        grid=(Bp // tb,),
        in_specs=[
            pl.BlockSpec((tb, S), lambda i: (i, 0)),   # batch-tiled activations
            resident((S, H1p)),
            resident((1, H1p)),
            resident((H1p, H2p)),
            resident((1, H2p)),
            resident((H2p, A)),
            resident((1, A)),
        ],
        # True action width (A == full array dim): ~32x less HBM writeback than
        # a 128-lane padded f32 output.
        out_specs=pl.BlockSpec((tb, A), lambda i: (i, 0)),
        compiler_params=pltpu.CompilerParams(
            dimension_semantics=("parallel",),  # shard batch tiles across TCs on v7x
        ),
    )(xp, w1, b1, w2, b2, w3, b3)

    return out[:B]


def init_params(key, state_size, action_size, fc1_units=64, fc2_units=64):
    """PyTorch nn.Linear-style init (U[-1/sqrt(fan_in), 1/sqrt(fan_in)]).
    Weights stored transposed: [in_features, out_features]."""
    ks = jax.random.split(key, 6)

    def layer(kw, kb, fan_in, fan_out):
        bound = 1.0 / (fan_in ** 0.5)
        w = jax.random.uniform(kw, (fan_in, fan_out), jnp.float32, -bound, bound)
        b = jax.random.uniform(kb, (1, fan_out), jnp.float32, -bound, bound)
        return w, b

    w1, b1 = layer(ks[0], ks[1], state_size, fc1_units)
    w2, b2 = layer(ks[2], ks[3], fc1_units, fc2_units)
    w3, b3 = layer(ks[4], ks[5], fc2_units, action_size)
    return {"w1": w1, "b1": b1, "w2": w2, "b2": b2, "w3": w3, "b3": b3}


if __name__ == "__main__":
    key = jax.random.PRNGKey(0)
    k_params, k_x = jax.random.split(key)

    batch = 8
    state_size = 8
    action_size = 4

    params = init_params(k_params, state_size, action_size, fc1_units=64, fc2_units=64)
    prepared = prepare_params(params)   # pad/cast weights ONCE, outside the jitted forward
    x = jax.random.normal(k_x, (batch, state_size), jnp.float32)

    fwd = jax.jit(functools.partial(qnetwork_forward, tile_b=2048))
    q_values = fwd(x, prepared)
    jax.block_until_ready(q_values)

    # Pure-JAX f32 reference. bf16 matmul operands -> looser tolerance.
    ref = jnp.maximum(x @ params["w1"] + params["b1"], 0.0)
    ref = jnp.maximum(ref @ params["w2"] + params["b2"], 0.0)
    ref = ref @ params["w3"] + params["b3"]

    assert q_values.shape == (batch, action_size)
    assert jnp.allclose(q_values, ref, atol=1e-2, rtol=1e-2), (
        "max abs err = %e" % float(jnp.max(jnp.abs(q_values - ref))))

    print("KERNEL_OK")
</pallas_src>

<mosaic_0001>
module attributes {stable_mosaic.version = 11 : i64} {
  func.func @qnetwork_kernel(%arg0: i32, %arg1: memref<16x8xbf16, #tpu.memory_space<vmem>>, %arg2: memref<8x128xbf16, #tpu.memory_space<vmem>>, %arg3: memref<1x128xf32, #tpu.memory_space<vmem>>, %arg4: memref<128x128xbf16, #tpu.memory_space<vmem>>, %arg5: memref<1x128xf32, #tpu.memory_space<vmem>>, %arg6: memref<128x4xbf16, #tpu.memory_space<vmem>>, %arg7: memref<1x4xf32, #tpu.memory_space<vmem>>, %arg8: memref<16x4xf32, #tpu.memory_space<vmem>>) attributes {dimension_semantics = [#tpu.dimension_semantics<parallel>], iteration_bounds = array<i64: 1>, scalar_prefetch = 0 : i64, scratch_operands = 0 : i64, tpu.core_type = #tpu.core_type<tc>, window_params = [{transform_indices = @transform_0, window_bounds = array<i64: 16, 8>}, {pipeline_mode = #tpu.pipeline_mode<synchronous>, transform_indices = @transform_1, window_bounds = array<i64: 8, 128>}, {pipeline_mode = #tpu.pipeline_mode<synchronous>, transform_indices = @transform_2, window_bounds = array<i64: 1, 128>}, {pipeline_mode = #tpu.pipeline_mode<synchronous>, transform_indices = @transform_3, window_bounds = array<i64: 128, 128>}, {pipeline_mode = #tpu.pipeline_mode<synchronous>, transform_indices = @transform_4, window_bounds = array<i64: 1, 128>}, {pipeline_mode = #tpu.pipeline_mode<synchronous>, transform_indices = @transform_5, window_bounds = array<i64: 128, 4>}, {pipeline_mode = #tpu.pipeline_mode<synchronous>, transform_indices = @transform_6, window_bounds = array<i64: 1, 4>}, {transform_indices = @transform_7, window_bounds = array<i64: 16, 4>}]} {
    %c0 = arith.constant 0 : index
    %c0_0 = arith.constant 0 : index
    %0 = vector.load %arg1[%c0, %c0_0] : memref<16x8xbf16, #tpu.memory_space<vmem>>, vector<16x8xbf16>
    %c0_1 = arith.constant 0 : index
    %c0_2 = arith.constant 0 : index
    %1 = vector.load %arg2[%c0_1, %c0_2] : memref<8x128xbf16, #tpu.memory_space<vmem>>, vector<8x128xbf16>
    %cst = arith.constant dense<0.000000e+00> : vector<16x128xf32>
    %2 = tpu.matmul %0, %1, %cst {dimension_numbers = #tpu.dot_dimension_numbers<[1], [0], [0], [1], [0, 0, 1, 1], [], []>} : vector<16x8xbf16>, vector<8x128xbf16>, vector<16x128xf32> -> vector<16x128xf32>
    %c0_3 = arith.constant 0 : index
    %c0_4 = arith.constant 0 : index
    %3 = vector.load %arg3[%c0_3, %c0_4] : memref<1x128xf32, #tpu.memory_space<vmem>>, vector<1x128xf32>
    %4 = vector.broadcast %3 : vector<1x128xf32> to vector<16x128xf32>
    %5 = arith.addf %2, %4 : vector<16x128xf32>
    %cst_5 = arith.constant 0.000000e+00 : f32
    %6 = vector.broadcast %cst_5 : f32 to vector<16x128xf32>
    %7 = arith.maximumf %5, %6 : vector<16x128xf32>
    %8 = arith.truncf %7 : vector<16x128xf32> to vector<16x128xbf16>
    %c0_6 = arith.constant 0 : index
    %c0_7 = arith.constant 0 : index
    %9 = vector.load %arg4[%c0_6, %c0_7] : memref<128x128xbf16, #tpu.memory_space<vmem>>, vector<128x128xbf16>
    %cst_8 = arith.constant dense<0.000000e+00> : vector<16x128xf32>
    %10 = tpu.matmul %8, %9, %cst_8 {dimension_numbers = #tpu.dot_dimension_numbers<[1], [0], [0], [1], [0, 0, 1, 1], [], []>} : vector<16x128xbf16>, vector<128x128xbf16>, vector<16x128xf32> -> vector<16x128xf32>
    %c0_9 = arith.constant 0 : index
    %c0_10 = arith.constant 0 : index
    %11 = vector.load %arg5[%c0_9, %c0_10] : memref<1x128xf32, #tpu.memory_space<vmem>>, vector<1x128xf32>
    %12 = vector.broadcast %11 : vector<1x128xf32> to vector<16x128xf32>
    %13 = arith.addf %10, %12 : vector<16x128xf32>
    %cst_11 = arith.constant 0.000000e+00 : f32
    %14 = vector.broadcast %cst_11 : f32 to vector<16x128xf32>
    %15 = arith.maximumf %13, %14 : vector<16x128xf32>
    %16 = arith.truncf %15 : vector<16x128xf32> to vector<16x128xbf16>
    %c0_12 = arith.constant 0 : index
    %c0_13 = arith.constant 0 : index
    %17 = vector.load %arg6[%c0_12, %c0_13] : memref<128x4xbf16, #tpu.memory_space<vmem>>, vector<128x4xbf16>
    %cst_14 = arith.constant dense<0.000000e+00> : vector<16x4xf32>
    %18 = tpu.matmul %16, %17, %cst_14 {dimension_numbers = #tpu.dot_dimension_numbers<[1], [0], [0], [1], [0, 0, 1, 1], [], []>} : vector<16x128xbf16>, vector<128x4xbf16>, vector<16x4xf32> -> vector<16x4xf32>
    %c0_15 = arith.constant 0 : index
    %c0_16 = arith.constant 0 : index
    %19 = vector.load %arg7[%c0_15, %c0_16] : memref<1x4xf32, #tpu.memory_space<vmem>>, vector<1x4xf32>
    %20 = vector.broadcast %19 : vector<1x4xf32> to vector<16x4xf32>
    %21 = arith.addf %18, %20 : vector<16x4xf32>
    %c0_17 = arith.constant 0 : index
    %c0_18 = arith.constant 0 : index
    %22 = vector.load %arg8[%c0_17, %c0_18] : memref<16x4xf32, #tpu.memory_space<vmem>>, vector<16x4xf32>
    tpu.vector_store %arg8[%c0_17, %c0_18], %21 {strides = array<i32>} : memref<16x4xf32, #tpu.memory_space<vmem>>, vector<16x4xf32>,
    return
  }
  func.func @transform_0(%arg0: i32) -> (i32, i32) {
    %c0_i32 = arith.constant 0 : i32
    %c0_i32_0 = arith.constant 0 : i32
    return %arg0, %c0_i32 : i32, i32
  }
  func.func @transform_1(%arg0: i32) -> (i32, i32) {
    %c0_i32 = arith.constant 0 : i32
    %c0_i32_0 = arith.constant 0 : i32
    %c0_i32_1 = arith.constant 0 : i32
    return %c0_i32, %c0_i32_0 : i32, i32
  }
  func.func @transform_2(%arg0: i32) -> (i32, i32) {
    %c0_i32 = arith.constant 0 : i32
    %c0_i32_0 = arith.constant 0 : i32
    %c0_i32_1 = arith.constant 0 : i32
    return %c0_i32, %c0_i32_0 : i32, i32
  }
  func.func @transform_3(%arg0: i32) -> (i32, i32) {
    %c0_i32 = arith.constant 0 : i32
    %c0_i32_0 = arith.constant 0 : i32
    %c0_i32_1 = arith.constant 0 : i32
    return %c0_i32, %c0_i32_0 : i32, i32
  }
  func.func @transform_4(%arg0: i32) -> (i32, i32) {
    %c0_i32 = arith.constant 0 : i32
    %c0_i32_0 = arith.constant 0 : i32
    %c0_i32_1 = arith.constant 0 : i32
    return %c0_i32, %c0_i32_0 : i32, i32
  }
  func.func @transform_5(%arg0: i32) -> (i32, i32) {
    %c0_i32 = arith.constant 0 : i32
    %c0_i32_0 = arith.constant 0 : i32
    %c0_i32_1 = arith.constant 0 : i32
    return %c0_i32, %c0_i32_0 : i32, i32
  }
  func.func @transform_6(%arg0: i32) -> (i32, i32) {
    %c0_i32 = arith.constant 0 : i32
    %c0_i32_0 = arith.constant 0 : i32
    %c0_i32_1 = arith.constant 0 : i32
    return %c0_i32, %c0_i32_0 : i32, i32
  }
  func.func @transform_7(%arg0: i32) -> (i32, i32) {
    %c0_i32 = arith.constant 0 : i32
    %c0_i32_0 = arith.constant 0 : i32
    return %arg0, %c0_i32 : i32, i32
  }
}

</mosaic_0001>

<bundles_post_ra>
// kernel: qnetwork_forward.1
= control target key start
LH: loop header
LB: loop body
LE: loop exit
PB: predicated region body
PF: predicated region fallthrough
CT: control target
= control target key end

     0   :  { %vm46_vm0 = vcmask 1043456   ;;  %v434_v0 = vmov 0.0   ;;  %vm435_vm1 = vmmov 0   ;;  %vm42_vm2 = vcmask 64512   ;;  %s565_s1 = inlined_call_operand.vmem [shape: bf16[8,128], index: 1, kind: input, shape index: {}]   ;;  %s566_s0 = inlined_call_operand.vmem [shape: bf16[16,8], index: 0, kind: input, shape index: {}]   ;;  %s567_s3 = inlined_call_operand.vmem [shape: bf16[128,128], index: 3, kind: input, shape index: {}]   ;;  %s568_s5 = inlined_call_operand.vmem [shape: bf16[128,4], index: 5, kind: input, shape index: {}]   ;;  %s569_s2 = inlined_call_operand.vmem [shape: f32[1,128], index: 2, kind: input, shape index: {}]   ;;  %s570_s4 = inlined_call_operand.vmem [shape: f32[1,128], index: 4, kind: input, shape index: {}]   ;;  %s571_s6 = inlined_call_operand.vmem [shape: f32[1,4], index: 6, kind: input, shape index: {}]   ;;  %s572_s7 = inlined_call_operand.vmem [shape: f32[16,4], index: 7, kind: output, shape index: {}]  }
   0x1   :  { %369 = vmatprep.subr.bf16.mxu0 %v434_v0  ;;  %v29_v1 = vld [vmem:[%s565_s1] sm:$0xf]  ;;  %371 = vmatprep.mubr.msk.bf16.mxu0 %vm435_vm1, %v434_v0  ;;  %v419_v5 = vld [vmem:[%s567_s3 + $0x8] sm:$0xff]   ;;  %v420_v6 = vld [vmem:[%s567_s3 + $0x10] sm:$0xff]   ;;  %vm321_vm3 = vcmask 31744  }
   0x2   :  { %v48_v2 = vsel %vm46_vm0, %v29_v1, 0  ;;  %v417_v3 = vld [vmem:[%s566_s0] sm:$0xff]   ;;  %375 = vmatprep.subr.bf16.mxu1 %v434_v0  ;;  %391 = vmatprep.mubr.msk.bf16.mxu1 %vm435_vm1, %v434_v0  ;;  %v421_v7 = vld [vmem:[%s567_s3 + $0x18] sm:$0xff]   ;;  %v423_v9 = vld [vmem:[%s567_s3 + $0x28] sm:$0xff]  }
   0x3   :  { %370 = vmatpush3.bf16.msra.mxu0 %v48_v2  ;;  %v418_v4 = vld [vmem:[%s567_s3] sm:$0xff]   ;;  %v424_v10 = vld [vmem:[%s567_s3 + $0x30] sm:$0xff]   ;;  %v425_v11 = vld [vmem:[%s567_s3 + $0x38] sm:$0xff]  }
   0x4   :  { %395 = vmatprep.subr.bf16.mxu0 %v434_v0  ;;  %376 = vmatpush3.bf16.msra.mxu1 %v418_v4  ;;  %v422_v8 = vld [vmem:[%s567_s3 + $0x20] sm:$0xff]   ;;  %v427_v13 = vld [vmem:[%s568_s5 + $0x8] sm:$0xff]   ;;  %v428_v14 = vld [vmem:[%s568_s5 + $0x10] sm:$0xff]  }
   0x5   :  { %377 = vmatprep.subr.bf16.mxu1 %v434_v0  ;;  %v426_v12 = vld [vmem:[%s568_s5] sm:$0xff]   ;;  %v429_v15 = vld [vmem:[%s568_s5 + $0x18] sm:$0xff]   ;;  %v431_v17 = vld [vmem:[%s568_s5 + $0x28] sm:$0xff]  }
   0x6   :  { %372 = vmatmul.mubr.msk.bf16.vlgmr.msra.gmra.mrb[0].mxu0 %vm42_vm2, %v417_v3  ;;  %v430_v16 = vld [vmem:[%s568_s5 + $0x20] sm:$0xff]   ;;  %v432_v28 = vld [vmem:[%s568_s5 + $0x30] sm:$0xff]   ;;  %v433_v29 = vld [vmem:[%s568_s5 + $0x38] sm:$0xff]  }
   0x7   :  { %411 = vmatprep.mubr.msk.bf16.mxu0 %vm435_vm1, %v434_v0  ;;  %396 = vmatpush3.bf16.msra.mxu0 %v426_v12  ;;  %v328_v18 = vld [vmem:[%s569_s2] ss:$0 sm:$0xff] }
   0x8   :  { %378 = vmatpush3.bf16.msra.mxu1 %v419_v5  ;;  %397 = vmatprep.subr.bf16.mxu0 %v434_v0  ;;  %v331_v30 = vld [vmem:[%s570_s4] ss:$0 sm:$0xff] }
   0x9   :  { %379 = vmatprep.subr.bf16.mxu1 %v434_v0  ;;  %v340_v40 = vld [vmem:[%s571_s6] ss:$0 sm:$0xff] }
   0xb   :  { %398 = vmatpush3.bf16.msra.mxu0 %v427_v13 }
   0xc   :  { %380 = vmatpush3.bf16.msra.mxu1 %v420_v6  ;;  %399 = vmatprep.subr.bf16.mxu0 %v434_v0 }
   0xd   :  { %381 = vmatprep.subr.bf16.mxu1 %v434_v0 }
   0xf   :  { %400 = vmatpush3.bf16.msra.mxu0 %v428_v14 }
  0x10   :  { %382 = vmatpush3.bf16.msra.mxu1 %v421_v7  ;;  %401 = vmatprep.subr.bf16.mxu0 %v434_v0 }
  0x11   :  { %383 = vmatprep.subr.bf16.mxu1 %v434_v0 }
  0x13   :  { %402 = vmatpush3.bf16.msra.mxu0 %v429_v15 }
  0x14   :  { %384 = vmatpush3.bf16.msra.mxu1 %v422_v8  ;;  %403 = vmatprep.subr.bf16.mxu0 %v434_v0 }
  0x15   :  { %385 = vmatprep.subr.bf16.mxu1 %v434_v0 }
  0x17   :  { %404 = vmatpush3.bf16.msra.mxu0 %v430_v16 }
  0x18   :  { %386 = vmatpush3.bf16.msra.mxu1 %v423_v9  ;;  %405 = vmatprep.subr.bf16.mxu0 %v434_v0 }
  0x19   :  { %387 = vmatprep.subr.bf16.mxu1 %v434_v0 }
  0x1b   :  { %406 = vmatpush3.bf16.msra.mxu0 %v431_v17 }
  0x1c   :  { %388 = vmatpush3.bf16.msra.mxu1 %v424_v10  ;;  %407 = vmatprep.subr.bf16.mxu0 %v434_v0 }
  0x1d   :  { %389 = vmatprep.subr.bf16.mxu1 %v434_v0 }
  0x1f   :  { %408 = vmatpush3.bf16.msra.mxu0 %v432_v28 }
  0x20   :  { %390 = vmatpush3.bf16.msra.mxu1 %v425_v11  ;;  %409 = vmatprep.subr.bf16.mxu0 %v434_v0 }
  0x23   :  { %410 = vmatpush3.bf16.msra.mxu0 %v433_v29 }
  0xd9   :  { %v84_v19 = vpop.f32.mrb[0].mxu0 }
  0xda   :  { %v85_v20 = vadd.f32 %v328_v18, %v84_v19  ;;  %v373_v21 = vpop.f32.mrb[1].mxu0 }
  0xdb   :  { %v87_v22 = vpop.f32.mrb[2].mxu0 }
  0xdc   :  { %v88_v23 = vadd.f32 %v328_v18, %v87_v22  ;;  %v374_v24 = vpop.f32.mrb[3].mxu0  ;;  %v91_v25 = vmax.f32 %v85_v20, 0.0 }
  0xde   :  { %v92_v26 = vmax.f32 %v88_v23, 0.0 }
  0xe0   :  { %v93_v27 = vpack.c.bf16 %v92_v26, %v91_v25 }
  0xe2   :  { %392 = vmatmul.mubr.bf16.vlgmr.msra.gmra.mrb[0].mxu1 %v93_v27 }
 0x1b5   :  { %v199_v31 = vpop.f32.mrb[0].mxu1 }
 0x1b6   :  { %v200_v32 = vadd.f32 %v331_v30, %v199_v31  ;;  %v393_v33 = vpop.f32.mrb[1].mxu1 }
 0x1b7   :  { %v202_v34 = vpop.f32.mrb[2].mxu1 }
 0x1b8   :  { %v203_v35 = vadd.f32 %v331_v30, %v202_v34  ;;  %v394_v36 = vpop.f32.mrb[3].mxu1  ;;  %v206_v37 = vmax.f32 %v200_v32, 0.0 }
 0x1ba   :  { %v207_v38 = vmax.f32 %v203_v35, 0.0 }
 0x1bc   :  { %v208_v39 = vpack.c.bf16 %v207_v38, %v206_v37 }
 0x1be   :  { %412 = vmatmul.mubr.bf16.vlgmr.msra.gmra.mrb[4].mxu0 %v208_v39 }
 0x291   :  { %v314_v41 = vpop.f32.mrb[4].mxu0 }
 0x292   :  { %v315_v42 = vadd.f32 %v340_v40, %v314_v41  ;;  %v413_v43 = vpop.f32.mrb[5].mxu0 }
 0x293   :  { %v317_v44 = vpop.f32.mrb[6].mxu0 }
 0x294   :  { %322 = vst.msk [vmem:[%s572_s7] sm:$0xff] %vm321_vm3, %v315_v42  ;;  %v318_v45 = vadd.f32 %v340_v40, %v317_v44  ;;  %v414_v46 = vpop.f32.mrb[7].mxu0 }
 0x296   :  { %323 = vst.msk [vmem:[%s572_s7 + $0x8] sm:$0xff] %vm321_vm3, %v318_v45 }

</bundles_post_ra>
